<compile_context>
chip_gen: v7x
topology: tpu7x:2x2x1
jax: 0.10.0
libtpu: 0.0.40
codegen_flags: <defaults>
</compile_context>

<pallas_src>
import numpy as np
import jax
import jax.numpy as jnp
from jax import lax
from jax.experimental import pallas as pl
from jax.experimental.pallas import tpu as pltpu


# ------------------------------ kernel bodies --------------------------------

def _dropin_kernel(x_ref, onehot_ref, o_ref):
    # x_ref:      (TR, W)   row tile of the flattened input
    # onehot_ref: (W, NS)   resident one-hot selection matrix
    # o_ref:      (TR, NS)  gathered output tile
    o_ref[...] = jnp.dot(
        x_ref[...], onehot_ref[...], preferred_element_type=jnp.float32
    ).astype(o_ref.dtype)


def _dropin_kernel_kblocked(x_ref, onehot_ref, o_ref, acc_ref):
    # Large-W variant: accumulate partial one-hot matmuls over the W (K) axis
    # in an f32 VMEM scratch (P3 init/finalize pattern).
    k = pl.program_id(1)

    @pl.when(k == 0)
    def _():
        acc_ref[...] = jnp.zeros_like(acc_ref)

    acc_ref[...] += jnp.dot(
        x_ref[...], onehot_ref[...], preferred_element_type=jnp.float32
    )

    @pl.when(k == pl.num_programs(1) - 1)
    def _():
        o_ref[...] = acc_ref[...].astype(o_ref.dtype)


# ------------------------------ helpers ---------------------------------------

def _round_up(x, m):
    return ((x + m - 1) // m) * m


def _round_down(x, m):
    return max(m, (x // m) * m)


def _tpu_policy():
    """Return (vmem_capacity_bytes, num_tensorcores) with safe fallbacks."""
    vmem_cap = 64 << 20   # conservative default: fits v7x (64 MiB physical)
    num_tc = 2            # conservative default: assume 2 TCs (only affects tiling)
    try:
        info = pltpu.get_tpu_info()
        cap = int(getattr(info, "vmem_capacity_bytes", 0) or 0)
        if cap > 0:
            vmem_cap = cap
    except Exception:
        pass
    try:
        kind = jax.devices()[0].device_kind.lower()
        # v5e / v6e are single-TensorCore parts: grid steps are strictly serial.
        if ("v5 lite" in kind) or ("v5e" in kind) or ("v6" in kind):
            num_tc = 1
    except Exception:
        pass
    return vmem_cap, num_tc


# ------------------------------ wrapper ---------------------------------------

def drop_in(x, key, num_select):
    """Pallas equivalent of DropIn(num_select).forward(x) with explicit PRNG key.

    Returns (out, idx) where out = x[..., idx] and idx are the selected columns.
    """
    *lead, W = x.shape
    assert 0 < num_select <= W
    # One-hot matmul gather is exact only for floating-point inputs.
    assert jnp.issubdtype(x.dtype, jnp.floating), "drop_in supports float dtypes only"
    # TODO(synk): NaN/Inf in *unselected* columns pollute the MXU sum (0*NaN=NaN);
    # a true gather would ignore them. Fine for finite inputs.

    dsize = jnp.dtype(x.dtype).itemsize
    sub = 8 * max(1, 4 // dsize)  # packed sublane multiple: 8 f32, 16 bf16, 32 fp8

    # torch.randperm(W)[:num_select] equivalent (cheap glue, not the hot path).
    idx = jax.random.permutation(key, W)[:num_select].astype(jnp.int32)

    # ---- output lane width: pad to a 128 multiple only when it is cheap -------
    ns_pad128 = _round_up(num_select, 128)
    if ns_pad128 == num_select or ns_pad128 * 4 <= num_select * 5:  # <=25% inflation
        NS = ns_pad128            # lane-dense, unmasked stores
    else:
        NS = num_select           # masked lane stores, but no inflated HBM writes
    if NS > num_select:
        # -1 never matches an iota row -> padded one-hot columns are all-zero.
        idx_oh = jnp.concatenate([idx, jnp.full((NS - num_select,), -1, jnp.int32)])
    else:
        idx_oh = idx

    R = int(np.prod(lead)) if lead else 1
    x2 = x.reshape(R, W)

    # ---- generation-aware tiling policy ---------------------------------------
    vmem_cap, num_tc = _tpu_policy()
    tile_budget = max(32 << 20, vmem_cap - (24 << 20))  # ~40 MiB v7x, ~104 MiB v5e/v6e

    def vmem_bytes(tr, tk):
        # x / out double-buffered; one-hot counted 2x (buffer_count copies are
        # allocated even for a constant index_map); f32 accumulator scratch.
        return (2 * tr * tk * dsize + 2 * tr * NS * dsize
                + 2 * tk * NS * dsize + tr * NS * 4)

    TR = min(512, _round_up(R, sub))
    if num_tc > 1:
        # >=2 grid steps per TensorCore so each core still overlaps DMA/compute.
        per_core_tr = max(sub, (pl.cdiv(R, 2 * num_tc) // sub) * sub)
        TR = min(TR, per_core_tr)

    # Prefer blocking W (K axis) over shrinking TR: big row tiles keep this
    # mem-bound kernel on the HBM roofline; the per-row-tile one-hot re-read is small.
    TK = W
    while TK > 128 and vmem_bytes(TR, TK) > tile_budget:
        TK = _round_down(TK // 2, 128)
    while TR > sub and vmem_bytes(TR, TK) > tile_budget:
        TR = _round_down(TR // 2, sub)

    n_k = pl.cdiv(W, TK)
    W_oh = W
    if n_k > 1 and W % TK != 0:
        # Ragged K blocks would multiply unspecified padded x data with
        # unspecified padded one-hot data; pad both explicitly with zeros.
        # (Only happens in the extreme large-W regime.)
        W_oh = _round_up(W, TK)
        x2 = jnp.pad(x2, ((0, 0), (0, W_oh - W)))

    onehot = (
        lax.broadcasted_iota(jnp.int32, (W_oh, NS), 0) == idx_oh[None, :]
    ).astype(x.dtype)

    grid_rows = pl.cdiv(R, TR)  # ragged last row block: padded reads, masked stores
    vmem_limit = int(min(max(vmem_bytes(TR, TK) + (4 << 20), 32 << 20), vmem_cap))
    cost = pl.CostEstimate(
        flops=2 * R * W_oh * NS,
        transcendentals=0,
        bytes_accessed=(R * W_oh + R * NS + grid_rows * W_oh * NS) * dsize,
    )

    if n_k == 1:
        grid_spec = pltpu.PrefetchScalarGridSpec(
            num_scalar_prefetch=0,
            grid=(grid_rows,),
            in_specs=[
                pl.BlockSpec((TR, W_oh), lambda i: (i, 0)),
                # One-hot stays resident across all grid steps (constant index).
                pl.BlockSpec((W_oh, NS), lambda i: (0, 0)),
            ],
            out_specs=pl.BlockSpec((TR, NS), lambda i: (i, 0)),
        )
        kernel = _dropin_kernel
        semantics = ("parallel",)
    else:
        grid_spec = pltpu.PrefetchScalarGridSpec(
            num_scalar_prefetch=0,
            grid=(grid_rows, n_k),
            in_specs=[
                pl.BlockSpec((TR, TK), lambda i, k: (i, k)),
                pl.BlockSpec((TK, NS), lambda i, k: (k, 0)),
            ],
            out_specs=pl.BlockSpec((TR, NS), lambda i, k: (i, 0)),
            scratch_shapes=[pltpu.VMEM((TR, NS), jnp.float32)],
        )
        kernel = _dropin_kernel_kblocked
        semantics = ("parallel", "arbitrary")

    out2 = pl.pallas_call(
        kernel,
        out_shape=jax.ShapeDtypeStruct((R, NS), x.dtype),
        grid_spec=grid_spec,
        compiler_params=pltpu.CompilerParams(
            dimension_semantics=semantics,
            vmem_limit_bytes=vmem_limit,
        ),
        cost_estimate=cost,
    )(x2, onehot)

    out = out2 if NS == num_select else out2[:, :num_select]
    return out.reshape(*lead, num_select), idx


if __name__ == "__main__":
    key = jax.random.PRNGKey(0)
    k_x, k_perm = jax.random.split(key)

    # Small shapes consistent with the module: NCHW input, select along W.
    B, C, H, W = 2, 4, 16, 16
    num_select = 8

    x = jax.random.normal(k_x, (B, C, H, W), dtype=jnp.float32)

    out, idx = drop_in(x, k_perm, num_select)
    out = jax.block_until_ready(out)

    # Reference: plain JAX gather with the same indices.
    ref = jnp.take(x, idx, axis=-1)
    assert out.shape == (B, C, H, num_select), out.shape
    np.testing.assert_allclose(np.asarray(out), np.asarray(ref), rtol=0, atol=0)

    print("KERNEL_OK")
</pallas_src>

<mosaic_0001>
module attributes {stable_mosaic.version = 11 : i64} {
  func.func @_dropin_kernel(%arg0: i32, %arg1: memref<32x16xf32, #tpu.memory_space<vmem>>, %arg2: memref<16x8xf32, #tpu.memory_space<vmem>>, %arg3: memref<32x8xf32, #tpu.memory_space<vmem>>) attributes {dimension_semantics = [#tpu.dimension_semantics<parallel>], iteration_bounds = array<i64: 4>, scalar_prefetch = 0 : i64, scratch_operands = 0 : i64, tpu.core_type = #tpu.core_type<tc>, window_params = [{transform_indices = @transform_0, window_bounds = array<i64: 32, 16>}, {pipeline_mode = #tpu.pipeline_mode<synchronous>, transform_indices = @transform_1, window_bounds = array<i64: 16, 8>}, {transform_indices = @transform_2, window_bounds = array<i64: 32, 8>}]} {
    %c0 = arith.constant 0 : index
    %c0_0 = arith.constant 0 : index
    %0 = vector.load %arg1[%c0, %c0_0] : memref<32x16xf32, #tpu.memory_space<vmem>>, vector<32x16xf32>
    %c0_1 = arith.constant 0 : index
    %c0_2 = arith.constant 0 : index
    %1 = vector.load %arg2[%c0_1, %c0_2] : memref<16x8xf32, #tpu.memory_space<vmem>>, vector<16x8xf32>
    %cst = arith.constant dense<0.000000e+00> : vector<32x8xf32>
    %2 = tpu.matmul %0, %1, %cst {dimension_numbers = #tpu.dot_dimension_numbers<[1], [0], [0], [1], [0, 0, 1, 1], [], []>} : vector<32x16xf32>, vector<16x8xf32>, vector<32x8xf32> -> vector<32x8xf32>
    %c0_3 = arith.constant 0 : index
    %c0_4 = arith.constant 0 : index
    %3 = vector.load %arg3[%c0_3, %c0_4] : memref<32x8xf32, #tpu.memory_space<vmem>>, vector<32x8xf32>
    tpu.vector_store %arg3[%c0_3, %c0_4], %2 {strides = array<i32>} : memref<32x8xf32, #tpu.memory_space<vmem>>, vector<32x8xf32>,
    return
  }
  func.func @transform_0(%arg0: i32) -> (i32, i32) {
    %c0_i32 = arith.constant 0 : i32
    %c0_i32_0 = arith.constant 0 : i32
    return %arg0, %c0_i32 : i32, i32
  }
  func.func @transform_1(%arg0: i32) -> (i32, i32) {
    %c0_i32 = arith.constant 0 : i32
    %c0_i32_0 = arith.constant 0 : i32
    %c0_i32_1 = arith.constant 0 : i32
    return %c0_i32, %c0_i32_0 : i32, i32
  }
  func.func @transform_2(%arg0: i32) -> (i32, i32) {
    %c0_i32 = arith.constant 0 : i32
    %c0_i32_0 = arith.constant 0 : i32
    return %arg0, %c0_i32 : i32, i32
  }
}

</mosaic_0001>

<bundles_post_ra>
// kernel: tpu_custom_call.1
= control target key start
LH: loop header
LB: loop body
LE: loop exit
PB: predicated region body
PF: predicated region fallthrough
CT: control target
= control target key end

     0   :  { %s380_s9 = smov 0   ;;  %s403_s0 = inlined_call_operand.vmem [shape: f32[128,16], index: 0, kind: input, shape index: {}]   ;;  %s404_s1 = inlined_call_operand.vmem [shape: f32[16,8], index: 1, kind: input, shape index: {}]   ;;  %s405_s2 = inlined_call_operand.vmem [shape: f32[128,8], index: 2, kind: output, shape index: {}]  }
   0x1 LB: > { %s312_s10 = sadd.s32 4294967295, %s363_s9   ;;  %p316_p0 = scmp.ge.s32.totalorder %s363_s9, 1  ;;  %s363_s9 = sphi %s380_s9, %s12_s9  }
   0x2   : > { %p113_p1 = scmp.lt.s32.totalorder %s363_s9, 5 }
   0x4   : > { %p114_p2 = pnand %p316_p0, %p113_p1 }
   0x5   : > { %v151_v0 = vld [vmem:[%s404_s1] sm:$0xff] (!%p114_p2)  ;;  %v152_v1 = vld [vmem:[%s404_s1 + $0x8] sm:$0xff] (!%p114_p2)  ;;  %s317_s15 = sshll.u32 (!%p114_p2), %s312_s10, 2  ;;  %vm153_vm0 = vcmask (!%p114_p2), 130048   ;;  %vm251_vm1 = vcmask (!%p114_p2), 64512  }
   0x6   : > { %117 = sbr.rel (%p114_p2) target bundleno = 232 (0xe8), region = 28  ;;  %v343_v2 = vpack.c.bf16 (!%p114_p2), %v152_v1, %v151_v0  ;;  %p136_p3 = scmp.lt.s32.totalorder (!%p114_p2), %s317_s15, 15 }
   0x8   : > { %344 = vmatprep.subr.bf16.mxu0 (!%p114_p2), %v343_v2  ;;  %347 = vmatprep.subr.bf16.mxu1 (!%p114_p2), %v343_v2 }
   0x9   : > { %346 = vmatpush3.bf16.msra.mxu0 (!%p114_p2), %v343_v2  ;;  %348 = vmatpush3.bf16.msra.mxu1 (!%p114_p2), %v343_v2 }
   0xd   : > { %s407_s15 = smov (!%p136_p3, %s317_s15), 15 }
   0xe   : > { %s318_s16 = sshll.u32 %s407_s15, 3 }
   0xf   : > { %s139_s19 = scalar_lea.vmem %s403_s0, %s318_s16  ;;  %s145_s22 = scalar_lea.vmem %s405_s2, %s318_s16 }
  0x10   : > { %v147_v3 = vld [vmem:[%s139_s19] sm:$0xff]  ;;  %v149_v4 = vld [vmem:[%s139_s19 + $0x10] sm:$0xff]  ;;  %v148_v5 = vld [vmem:[%s139_s19 + $0x8] sm:$0xff] }
  0x11   : > { %337 = vmatprep.mubr.msk.f32.mxu0 %vm153_vm0, %v147_v3  ;;  %340 = vmatprep.mubr.msk.f32.mxu1 %vm153_vm0, %v149_v4  ;;  %v150_v6 = vld [vmem:[%s139_s19 + $0x18] sm:$0xff] }
  0x12   : > { %338 = vmatmul.mubr.msk.f32.vlgmr.msra.gmra.mrb[0].mxu0 %vm153_vm0, %v148_v5  ;;  %341 = vmatmul.mubr.msk.f32.vlgmr.msra.gmra.mrb[0].mxu1 %vm153_vm0, %v150_v6 }
  0xe5   : > { %v339_v7 = vpop.f32.mrb[0].mxu0  ;;  %v342_v8 = vpop.f32.mrb[0].mxu1 }
  0xe6   : > { %253 = vst.msk [vmem:[%s145_s22 + $0x8] sm:$0xff] %vm251_vm1, %v339_v7  ;;  %255 = vst.msk [vmem:[%s145_s22 + $0x18] sm:$0xff] %vm251_vm1, %v342_v8  ;;  %v232_v9 = vpop.f32.mrb[1].mxu0  ;;  %v242_v10 = vpop.f32.mrb[1].mxu1 }
  0xe7   : > { %252 = vst.msk [vmem:[%s145_s22] sm:$0xff] %vm251_vm1, %v232_v9  ;;  %254 = vst.msk [vmem:[%s145_s22 + $0x10] sm:$0xff] %vm251_vm1, %v242_v10 }
  0xe8 PF: > { %s12_s9 = sadd.s32 1, %s363_s9  }
  0xe9   : > { %p9_p4 = scmp.ge.s32.totalorder %s12_s9, 6  }
  0xeb   :  { %11 = sbr.rel (!%p9_p4) target bundleno = 1 (0x1), region = 58 }

</bundles_post_ra>
